<compile_context>
chip_gen: v7x
topology: tpu7x:2x2x1
jax: 0.10.0
libtpu: 0.0.40
codegen_flags: <defaults>
</compile_context>

<pallas_src>
import jax
import jax.numpy as jnp
from jax.experimental import pallas as pl
from jax.experimental.pallas import tpu as pltpu

# deterministic RReLU (eval-mode) negative slope
_RRELU_SLOPE = (1.0 / 8.0 + 1.0 / 3.0) / 2.0
_LANE = 128


def _round_up(n, m):
    return ((n + m - 1) // m) * m


def _vmem_capacity_bytes():
    try:
        return int(pltpu.get_tpu_info().vmem_capacity_bytes)
    except Exception:
        return 64 * 1024 * 1024  # conservative default (v7x-sized VMEM)


def _choose_tb(B, block_b):
    """Batch tile: multiple of 16, bounded padding, >=2 grid steps when worthwhile."""
    if B <= block_b:
        if B >= 128:
            # split so both v7x TensorCores get work; cheap on 1-TC chips
            return _round_up(pl.cdiv(B, 2), 16)
        return B  # single full-dim block; always layout-legal
    nsteps = _round_up(pl.cdiv(B, block_b), 2)
    return _round_up(pl.cdiv(B, nsteps), 16)


def _net_kernel(x_ref, w1_ref, b1_ref, w2_ref, b2_ref, o_ref):
    # cast x to bf16 in-kernel (VPU op, hidden under the MXU slot)
    x = x_ref[...].astype(jnp.bfloat16)
    # fc1: bf16 operands on the MXU, f32 accumulation
    h = jnp.dot(x, w1_ref[...], preferred_element_type=jnp.float32)
    h = h + b1_ref[...]                         # broadcast [1, Hp] over [TB, Hp]
    h = jnp.where(h >= 0, h, _RRELU_SLOPE * h)  # eval-mode rrelu, f32 epilogue
    # fc2: cast hidden to bf16 only for the MXU; keep accumulation/epilogue in f32
    y = jnp.dot(h.astype(jnp.bfloat16), w2_ref[...],
                preferred_element_type=jnp.float32)
    y = y + b2_ref[...]                         # broadcast [1, Cp] over [TB, Cp]
    y = jnp.where(y >= 0, y, _RRELU_SLOPE * y)
    o_ref[...] = y.astype(o_ref.dtype)


def prepare_params(w1, b1, w2, b2):
    """One-time weight prep: lane-dense pad (multiples of 128) + bf16 cast."""
    K, H = w1.shape
    C = w2.shape[1]
    Hp = _round_up(H, _LANE)
    Cp = _round_up(C, _LANE)
    w1p = jnp.pad(w1, ((0, 0), (0, Hp - H))).astype(jnp.bfloat16)      # [K, Hp]
    b1p = jnp.pad(jnp.reshape(b1, (1, H)),
                  ((0, 0), (0, Hp - H))).astype(jnp.float32)           # [1, Hp]
    w2p = jnp.pad(w2, ((0, Hp - H), (0, Cp - C))).astype(jnp.bfloat16)  # [Hp, Cp]
    b2p = jnp.pad(jnp.reshape(b2, (1, C)),
                  ((0, 0), (0, Cp - C))).astype(jnp.float32)           # [1, Cp]
    return (w1p, b1p, w2p, b2p, C)


def net_forward(x, params, *, block_b=None):
    """Two-layer MLP with eval-mode RReLU, fused in one Pallas kernel.

    x:      [B, input_size] float32 (unpadded; cast to bf16 inside the kernel)
    params: output of prepare_params()
    returns [B, num_classes] float32
    """
    w1p, b1p, w2p, b2p, C = params
    B, K = x.shape
    assert w1p.shape[0] == K, "x feature dim must match w1"
    Hp = w1p.shape[1]
    Cp = w2p.shape[1]

    vmem_cap = _vmem_capacity_bytes()
    if block_b is None:
        block_b = 256 if vmem_cap <= 64 * 1024 * 1024 else 512

    TB = _choose_tb(B, block_b)
    grid = (pl.cdiv(B, TB),)

    # VMEM budget: resident weights counted once (constant index_map = single
    # buffer), x/out tiles double-buffered, plus f32/bf16 intermediates; ~35%
    # headroom, capped at ~7/8 of physical VMEM for this generation.
    vmem_bytes = (
        (K * Hp + Hp * Cp) * 2        # resident bf16 weights
        + (Hp + Cp) * 4               # resident f32 biases
        + 2 * TB * K * 4              # x tile, double-buffered, f32
        + 2 * TB * Cp * 4             # out tile, double-buffered, f32
        + TB * Hp * (4 + 2)           # f32 hidden + its bf16 copy
        + TB * Cp * 4                 # f32 y before the store cast
    )
    cap = (vmem_cap * 7) // 8
    vmem_limit = int(min(max(32 * 1024 * 1024, int(1.35 * vmem_bytes)), cap))

    out_p = pl.pallas_call(
        _net_kernel,
        out_shape=jax.ShapeDtypeStruct((B, Cp), jnp.float32),
        grid_spec=pltpu.PrefetchScalarGridSpec(
            num_scalar_prefetch=0,
            grid=grid,
            in_specs=[
                pl.BlockSpec((TB, K), lambda i: (i, 0)),    # x: batch-tiled, unpadded K
                pl.BlockSpec((K, Hp), lambda i: (0, 0)),    # w1: VMEM-resident
                pl.BlockSpec((1, Hp), lambda i: (0, 0)),    # b1: resident
                pl.BlockSpec((Hp, Cp), lambda i: (0, 0)),   # w2: resident
                pl.BlockSpec((1, Cp), lambda i: (0, 0)),    # b2: resident
            ],
            out_specs=pl.BlockSpec((TB, Cp), lambda i: (i, 0)),
        ),
        compiler_params=pltpu.CompilerParams(
            dimension_semantics=("parallel",),
            vmem_limit_bytes=vmem_limit,
        ),
    )(x, w1p, b1p, w2p, b2p)

    # strip class-dim padding only (batch dim is exact thanks to the cdiv grid)
    return out_p if Cp == C else out_p[:, :C]


def init_params(key, input_size, hidden_size, num_classes):
    """Deterministic PyTorch-style Linear init: U(-1/sqrt(fan_in), 1/sqrt(fan_in))."""
    k1, k2, k3, k4 = jax.random.split(key, 4)
    bound1 = 1.0 / jnp.sqrt(jnp.float32(input_size))
    bound2 = 1.0 / jnp.sqrt(jnp.float32(hidden_size))
    w1 = jax.random.uniform(k1, (input_size, hidden_size), jnp.float32,
                            minval=-bound1, maxval=bound1)
    b1 = jax.random.uniform(k2, (1, hidden_size), jnp.float32,
                            minval=-bound1, maxval=bound1)
    w2 = jax.random.uniform(k3, (hidden_size, num_classes), jnp.float32,
                            minval=-bound2, maxval=bound2)
    b2 = jax.random.uniform(k4, (1, num_classes), jnp.float32,
                            minval=-bound2, maxval=bound2)
    return w1, b1, w2, b2


if __name__ == "__main__":
    # small shapes consistent with the module's forward
    batch, input_size, hidden_size, num_classes = 8, 32, 64, 16

    key = jax.random.PRNGKey(0)
    kx, kp = jax.random.split(key)
    x = jax.random.normal(kx, (batch, input_size), jnp.float32)
    w1, b1, w2, b2 = init_params(kp, input_size, hidden_size, num_classes)

    # weight pad/cast happens once, outside the per-call path
    params = prepare_params(w1, b1, w2, b2)

    out = net_forward(x, params)
    jax.block_until_ready(out)

    # pure-JAX f32 reference (same eval-mode rrelu semantics); tolerance loosened
    # because the kernel feeds the MXU bf16 (f32 accumulation / epilogue).
    def rrelu(v):
        return jnp.where(v >= 0, v, _RRELU_SLOPE * v)

    ref = rrelu(rrelu(x @ w1 + b1) @ w2 + b2)
    assert out.shape == (batch, num_classes)
    assert jnp.allclose(out, ref, atol=3e-2, rtol=3e-2), (
        float(jnp.max(jnp.abs(out - ref))))

    print("KERNEL_OK")
</pallas_src>

<mosaic_0001>
module attributes {stable_mosaic.version = 11 : i64} {
  func.func @_net_kernel(%arg0: i32, %arg1: memref<8x32xf32, #tpu.memory_space<vmem>>, %arg2: memref<32x128xbf16, #tpu.memory_space<vmem>>, %arg3: memref<1x128xf32, #tpu.memory_space<vmem>>, %arg4: memref<128x128xbf16, #tpu.memory_space<vmem>>, %arg5: memref<1x128xf32, #tpu.memory_space<vmem>>, %arg6: memref<8x128xf32, #tpu.memory_space<vmem>>) attributes {dimension_semantics = [#tpu.dimension_semantics<parallel>], iteration_bounds = array<i64: 1>, scalar_prefetch = 0 : i64, scratch_operands = 0 : i64, tpu.core_type = #tpu.core_type<tc>, window_params = [{transform_indices = @transform_0, window_bounds = array<i64: 8, 32>}, {pipeline_mode = #tpu.pipeline_mode<synchronous>, transform_indices = @transform_1, window_bounds = array<i64: 32, 128>}, {pipeline_mode = #tpu.pipeline_mode<synchronous>, transform_indices = @transform_2, window_bounds = array<i64: 1, 128>}, {pipeline_mode = #tpu.pipeline_mode<synchronous>, transform_indices = @transform_3, window_bounds = array<i64: 128, 128>}, {pipeline_mode = #tpu.pipeline_mode<synchronous>, transform_indices = @transform_4, window_bounds = array<i64: 1, 128>}, {transform_indices = @transform_5, window_bounds = array<i64: 8, 128>}]} {
    %c0 = arith.constant 0 : index
    %c0_0 = arith.constant 0 : index
    %0 = vector.load %arg1[%c0, %c0_0] : memref<8x32xf32, #tpu.memory_space<vmem>>, vector<8x32xf32>
    %1 = arith.truncf %0 : vector<8x32xf32> to vector<8x32xbf16>
    %c0_1 = arith.constant 0 : index
    %c0_2 = arith.constant 0 : index
    %2 = vector.load %arg2[%c0_1, %c0_2] : memref<32x128xbf16, #tpu.memory_space<vmem>>, vector<32x128xbf16>
    %cst = arith.constant dense<0.000000e+00> : vector<8x128xf32>
    %3 = tpu.matmul %1, %2, %cst {dimension_numbers = #tpu.dot_dimension_numbers<[1], [0], [0], [1], [0, 0, 1, 1], [], []>} : vector<8x32xbf16>, vector<32x128xbf16>, vector<8x128xf32> -> vector<8x128xf32>
    %c0_3 = arith.constant 0 : index
    %c0_4 = arith.constant 0 : index
    %4 = vector.load %arg3[%c0_3, %c0_4] : memref<1x128xf32, #tpu.memory_space<vmem>>, vector<1x128xf32>
    %5 = vector.broadcast %4 : vector<1x128xf32> to vector<8x128xf32>
    %6 = arith.addf %3, %5 : vector<8x128xf32>
    %cst_5 = arith.constant 0.000000e+00 : f32
    %7 = vector.broadcast %cst_5 : f32 to vector<8x128xf32>
    %8 = arith.cmpf oge, %6, %7 : vector<8x128xf32>
    %cst_6 = arith.constant 0.229166672 : f32
    %9 = vector.broadcast %cst_6 : f32 to vector<8x128xf32>
    %10 = arith.mulf %9, %6 : vector<8x128xf32>
    %11 = arith.select %8, %6, %10 : vector<8x128xi1>, vector<8x128xf32>
    %12 = arith.truncf %11 : vector<8x128xf32> to vector<8x128xbf16>
    %c0_7 = arith.constant 0 : index
    %c0_8 = arith.constant 0 : index
    %13 = vector.load %arg4[%c0_7, %c0_8] : memref<128x128xbf16, #tpu.memory_space<vmem>>, vector<128x128xbf16>
    %cst_9 = arith.constant dense<0.000000e+00> : vector<8x128xf32>
    %14 = tpu.matmul %12, %13, %cst_9 {dimension_numbers = #tpu.dot_dimension_numbers<[1], [0], [0], [1], [0, 0, 1, 1], [], []>} : vector<8x128xbf16>, vector<128x128xbf16>, vector<8x128xf32> -> vector<8x128xf32>
    %c0_10 = arith.constant 0 : index
    %c0_11 = arith.constant 0 : index
    %15 = vector.load %arg5[%c0_10, %c0_11] : memref<1x128xf32, #tpu.memory_space<vmem>>, vector<1x128xf32>
    %16 = vector.broadcast %15 : vector<1x128xf32> to vector<8x128xf32>
    %17 = arith.addf %14, %16 : vector<8x128xf32>
    %cst_12 = arith.constant 0.000000e+00 : f32
    %18 = vector.broadcast %cst_12 : f32 to vector<8x128xf32>
    %19 = arith.cmpf oge, %17, %18 : vector<8x128xf32>
    %cst_13 = arith.constant 0.229166672 : f32
    %20 = vector.broadcast %cst_13 : f32 to vector<8x128xf32>
    %21 = arith.mulf %20, %17 : vector<8x128xf32>
    %22 = arith.select %19, %17, %21 : vector<8x128xi1>, vector<8x128xf32>
    %c0_14 = arith.constant 0 : index
    %c0_15 = arith.constant 0 : index
    %23 = vector.load %arg6[%c0_14, %c0_15] : memref<8x128xf32, #tpu.memory_space<vmem>>, vector<8x128xf32>
    tpu.vector_store %arg6[%c0_14, %c0_15], %22 {strides = array<i32>} : memref<8x128xf32, #tpu.memory_space<vmem>>, vector<8x128xf32>,
    return
  }
  func.func @transform_0(%arg0: i32) -> (i32, i32) {
    %c0_i32 = arith.constant 0 : i32
    %c0_i32_0 = arith.constant 0 : i32
    return %arg0, %c0_i32 : i32, i32
  }
  func.func @transform_1(%arg0: i32) -> (i32, i32) {
    %c0_i32 = arith.constant 0 : i32
    %c0_i32_0 = arith.constant 0 : i32
    %c0_i32_1 = arith.constant 0 : i32
    return %c0_i32, %c0_i32_0 : i32, i32
  }
  func.func @transform_2(%arg0: i32) -> (i32, i32) {
    %c0_i32 = arith.constant 0 : i32
    %c0_i32_0 = arith.constant 0 : i32
    %c0_i32_1 = arith.constant 0 : i32
    return %c0_i32, %c0_i32_0 : i32, i32
  }
  func.func @transform_3(%arg0: i32) -> (i32, i32) {
    %c0_i32 = arith.constant 0 : i32
    %c0_i32_0 = arith.constant 0 : i32
    %c0_i32_1 = arith.constant 0 : i32
    return %c0_i32, %c0_i32_0 : i32, i32
  }
  func.func @transform_4(%arg0: i32) -> (i32, i32) {
    %c0_i32 = arith.constant 0 : i32
    %c0_i32_0 = arith.constant 0 : i32
    %c0_i32_1 = arith.constant 0 : i32
    return %c0_i32, %c0_i32_0 : i32, i32
  }
  func.func @transform_5(%arg0: i32) -> (i32, i32) {
    %c0_i32 = arith.constant 0 : i32
    %c0_i32_0 = arith.constant 0 : i32
    return %arg0, %c0_i32 : i32, i32
  }
}

</mosaic_0001>

<bundles_post_ra>
// kernel: tpu_custom_call.1
= control target key start
LH: loop header
LB: loop body
LE: loop exit
PB: predicated region body
PF: predicated region fallthrough
CT: control target
= control target key end

     0   :  { %10 = vsyncpa [#allocation3], 0  ;;  %s528_s0 = inlined_call_operand.hbm [shape: f32[8,32], index: 0, kind: input, shape index: {}]   ;;  %s529_s1 = inlined_call_operand.hbm [shape: bf16[32,128], index: 1, kind: input, shape index: {}]   ;;  %s530_s2 = inlined_call_operand.vmem [shape: f32[1,128], index: 2, kind: input, shape index: {}]   ;;  %s531_s3 = inlined_call_operand.hbm [shape: bf16[128,128], index: 3, kind: input, shape index: {}]   ;;  %s532_s4 = inlined_call_operand.vmem [shape: f32[1,128], index: 4, kind: input, shape index: {}]   ;;  %s533_s5 = inlined_call_operand.hbm [shape: f32[8,128], index: 5, kind: output, shape index: {}]  }
   0x1   :  { %11 = vsyncpa [#allocation6], 0 }
   0x2   :  { %12 = vsyncpa [#allocation4], 0  ;;  %s430_s18 = smov [#allocation5]   ;;  %s336_s22 = scalar_lea.hbm %s529_s1, 256 }
   0x3   :  { %s28_s19 = sshll.u32 %s430_s18, 4  ;;  %p337_p0 = scmp.ne.s32.totalorder %s529_s1, %s336_s22  ;;  %s29_s19 = int_to_ptr.vmem [resolvable:$true] %s28_s19 }
   0x4   :  { %p340_p1 = scmp.lt.u32.totalorder %s336_s22, %s529_s1 }
   0x6   :  { %p342_p2 = pnand %p340_p1, %p337_p0 }
   0x8   :  { %345 = shalt.err (!%p342_p2)
}
   0x9   :  { %s346_s27 = scalar_lea.vmem %s29_s19, 256  ;;  %p351_p4 = scmp.lt.s32.totalorder %s29_s19, %s29_s19 }
   0xa   :  { %p347_p3 = scmp.ne.s32.totalorder %s29_s19, %s346_s27  ;;  %p352_p5 = scmp.lt.s32.totalorder %s346_s27, %s346_s27 }
   0xc   :  { %p353_p6 = por %p352_p5, %p351_p4 }
   0xe   :  { %p354_p7 = pnand %p353_p6, %p347_p3 }
  0x10   :  { %357 = shalt.err (!%p354_p7)
}
  0x11   :  { %s431_s28 = smov 64   ;;  %s432_s29 = smov 4  }
  0x12   :  { %34 = dma.hbm_to_vmem [thread:$0]  %s529_s1, 256, %s29_s19, [#allocation6], %s431_s28, %s431_s28, %s432_s29  }
  0x13   :  { %s433_s7 = smov [#allocation2]   ;;  %s434_s9 = smov [#allocation7]  }
  0x14   :  { %s19_s8 = sshll.u32 %s433_s7, 4  ;;  %s42_s10 = sshll.u32 %s434_s9, 4  ;;  %s20_s8 = int_to_ptr.vmem [resolvable:$true] %s19_s8  ;;  %s43_s10 = int_to_ptr.vmem [resolvable:$true] %s42_s10 }
  0x15   :  { %s358_s13 = scalar_lea.hbm %s528_s0, 128 }
  0x16   :  { %p359_p8 = scmp.ne.s32.totalorder %s528_s0, %s358_s13  ;;  %p362_p9 = scmp.lt.u32.totalorder %s358_s13, %s528_s0 }
  0x18   :  { %p364_p10 = pnand %p362_p9, %p359_p8 }
  0x1a   :  { %367 = shalt.err (!%p364_p10)
}
  0x1b   :  { %s368_s1 = scalar_lea.vmem %s20_s8, 128  ;;  %p373_p12 = scmp.lt.s32.totalorder %s20_s8, %s20_s8 }
  0x1c   :  { %p369_p11 = scmp.ne.s32.totalorder %s20_s8, %s368_s1  ;;  %p374_p13 = scmp.lt.s32.totalorder %s368_s1, %s368_s1 }
  0x1e   :  { %p375_p0 = por %p374_p13, %p373_p12 }
  0x20   :  { %p376_p1 = pnand %p375_p0, %p369_p11 }
  0x22   :  { %379 = shalt.err (!%p376_p1)
}
  0x23   :  { %22 = dma.hbm_to_vmem [thread:$0]  %s528_s0, 128, %s20_s8, [#allocation3]  }
  0x24   :  { %s380_s22 = scalar_lea.hbm %s531_s3, 1024 }
  0x25   :  { %p381_p2 = scmp.ne.s32.totalorder %s531_s3, %s380_s22  ;;  %p384_p3 = scmp.lt.u32.totalorder %s380_s22, %s531_s3 }
  0x27   :  { %p386_p4 = pnand %p384_p3, %p381_p2 }
  0x29   :  { %389 = shalt.err (!%p386_p4)
}
  0x2a   :  { %s390_s27 = scalar_lea.vmem %s43_s10, 1024  ;;  %p395_p6 = scmp.lt.s32.totalorder %s43_s10, %s43_s10 }
  0x2b   :  { %p391_p5 = scmp.ne.s32.totalorder %s43_s10, %s390_s27  ;;  %p396_p7 = scmp.lt.s32.totalorder %s390_s27, %s390_s27 }
  0x2d   :  { %p397_p8 = por %p396_p7, %p395_p6 }
  0x2f   :  { %p398_p9 = pnand %p397_p8, %p391_p5 }
  0x31   :  { %401 = shalt.err (!%p398_p9)
}
  0x32   :  { %48 = dma.hbm_to_vmem [thread:$0]  %s531_s3, 1024, %s43_s10, [#allocation6], %s431_s28, %s431_s28, %s432_s29  }
  0x33   :  { %424 = dma.done.wait [#allocation3], 128  }
  0x34   :  { %425 = vsyncadd [#allocation3], 4294967168 }
  0x35   :  { %426 = dma.done.wait [#allocation6], 1280  }
  0x36   :  { %427 = vsyncadd [#allocation6], 4294966016  ;;  %v435_v0 = vmov 0.0   ;;  %vm436_vm0 = vmmov 0   ;;  %v326_v1 = vld [vmem:[#allocation5] sm:$0xff]   ;;  %v327_v2 = vld [vmem:[#allocation5 + $0x8] sm:$0xff]  }
  0x37   :  { %290 = vmatprep.subr.bf16.mxu0 %v435_v0  ;;  %294 = vmatprep.mubr.msk.bf16.mxu0 %vm436_vm0, %v435_v0  ;;  %v61_v3 = vld [vmem:[#allocation2] sm:$0xff]  ;;  %v328_v4 = vld [vmem:[#allocation7] sm:$0xff]   ;;  %vm86_vm1 = vcmask 261120   ;;  %v330_v7 = vld [vmem:[#allocation7 + $0x10] sm:$0xff]   ;;  %s437_s7 = smov [#allocation8]  }
  0x38   :  { %298 = vmatprep.subr.bf16.mxu1 %v435_v0  ;;  %314 = vmatprep.mubr.msk.bf16.mxu1 %vm436_vm0, %v435_v0  ;;  %v62_v5 = vpack.c.bf16 %v61_v3, %v61_v3  ;;  %v329_v6 = vld [vmem:[#allocation7 + $0x8] sm:$0xff]   ;;  %v331_v8 = vld [vmem:[#allocation7 + $0x18] sm:$0xff]   ;;  %v332_v9 = vld [vmem:[#allocation7 + $0x20] sm:$0xff]   ;;  %s255_s8 = sshll.u32 %s437_s7, 4  ;;  %s256_s8 = int_to_ptr.vmem [resolvable:$true] %s255_s8 }
  0x39   :  { %291 = vmatpush3.bf16.msra.mxu0 %v326_v1  ;;  %299 = vmatpush3.bf16.msra.mxu1 %v328_v4  ;;  %v333_v10 = vld [vmem:[#allocation7 + $0x28] sm:$0xff]   ;;  %v334_v11 = vld [vmem:[#allocation7 + $0x30] sm:$0xff]   ;;  %v335_v12 = vld [vmem:[#allocation7 + $0x38] sm:$0xff]   ;;  %p407_p11 = scmp.lt.s32.totalorder %s256_s8, %s256_s8 }
  0x3a   :  { %292 = vmatprep.subr.bf16.mxu0 %v435_v0  ;;  %300 = vmatprep.subr.bf16.mxu1 %v435_v0  ;;  %v265_v13 = vld [vmem:[%s530_s2] ss:$0 sm:$0xff]  ;;  %s402_s2 = scalar_lea.vmem %s256_s8, 128 }
  0x3b   :  { %v269_v22 = vld [vmem:[%s532_s4] ss:$0 sm:$0xff]  ;;  %p403_p10 = scmp.ne.s32.totalorder %s256_s8, %s402_s2  ;;  %p408_p12 = scmp.lt.s32.totalorder %s402_s2, %s402_s2 }
  0x3d   :  { %293 = vmatpush3.bf16.msra.mxu0 %v327_v2  ;;  %301 = vmatpush3.bf16.msra.mxu1 %v329_v6  ;;  %p409_p13 = por %p408_p12, %p407_p11 }
  0x3e   :  { %302 = vmatprep.subr.bf16.mxu1 %v435_v0 }
  0x3f   :  { %p410_p0 = pnand %p409_p13, %p403_p10 }
  0x40   :  { %295 = vmatmul.mubr.msk.bf16.vlgmr.msra.gmra.mrb[0].mxu0 %vm86_vm1, %v62_v5 }
  0x41   :  { %303 = vmatpush3.bf16.msra.mxu1 %v330_v7 }
  0x42   :  { %304 = vmatprep.subr.bf16.mxu1 %v435_v0 }
  0x45   :  { %305 = vmatpush3.bf16.msra.mxu1 %v331_v8 }
  0x46   :  { %306 = vmatprep.subr.bf16.mxu1 %v435_v0 }
  0x49   :  { %307 = vmatpush3.bf16.msra.mxu1 %v332_v9 }
  0x4a   :  { %308 = vmatprep.subr.bf16.mxu1 %v435_v0 }
  0x4d   :  { %309 = vmatpush3.bf16.msra.mxu1 %v333_v10 }
  0x4e   :  { %310 = vmatprep.subr.bf16.mxu1 %v435_v0 }
  0x51   :  { %311 = vmatpush3.bf16.msra.mxu1 %v334_v11 }
  0x52   :  { %312 = vmatprep.subr.bf16.mxu1 %v435_v0 }
  0x55   :  { %313 = vmatpush3.bf16.msra.mxu1 %v335_v12 }
 0x113   :  { %v124_v14 = vpop.f32.mrb[0].mxu0 }
 0x114   :  { %v125_v15 = vadd.f32 %v265_v13, %v124_v14  ;;  %v296_v16 = vpop.f32.mrb[1].mxu0 }
 0x115   :  { %v127_v17 = vpop.f32.mrb[2].mxu0 }
 0x116   :  { %vm130_vm2 = vcmp.ge.f32.partialorder %v125_v15, 0.0  ;;  %v131_v18 = vmul.f32 0.22916667, %v125_v15  ;;  %v297_v19 = vpop.f32.mrb[3].mxu0 }
 0x118   :  { %v132_v20 = vsel %vm130_vm2, %v125_v15, %v131_v18 }
 0x119   :  { %v133_v21 = vpack.c.bf16 %v132_v20, %v132_v20 }
 0x11b   :  { %315 = vmatmul.mubr.bf16.vlgmr.msra.gmra.mrb[0].mxu1 %v133_v21 }
 0x1ee   :  { %v239_v23 = vpop.f32.mrb[0].mxu1 }
 0x1ef   :  { %v240_v24 = vadd.f32 %v269_v22, %v239_v23  ;;  %v316_v25 = vpop.f32.mrb[1].mxu1 }
 0x1f0   :  { %v242_v26 = vpop.f32.mrb[2].mxu1 }
 0x1f1   :  { %v246_v27 = vmul.f32 0.22916667, %v240_v24  ;;  %v317_v28 = vpop.f32.mrb[3].mxu1  ;;  %vm245_vm3 = vcmp.ge.f32.partialorder %v240_v24, 0.0 }
 0x1f3   :  { %v247_v29 = vsel %vm245_vm3, %v240_v24, %v246_v27 }
 0x1f4   :  { %248 = vst [vmem:[#allocation8] sm:$0xff] %v247_v29 }
 0x1f5   :  { %413 = shalt.err (!%p410_p0)
}
 0x1f6   :  { %s414_s10 = scalar_lea.hbm %s533_s5, 128 }
 0x1f7   :  { %p415_p1 = scmp.ne.s32.totalorder %s533_s5, %s414_s10  ;;  %p418_p2 = scmp.lt.u32.totalorder %s414_s10, %s533_s5 }
 0x1f9   :  { %p420_p3 = pnand %p418_p2, %p415_p1 }
 0x1fb   :  { %423 = shalt.err (!%p420_p3)
}
 0x1fc   :  { %258 = dma.vmem_to_hbm [thread:$0]  %s256_s8, 128, %s533_s5, [#allocation4]  }
 0x1fd   :  { %428 = dma.done.wait [#allocation4], 128  }
 0x1fe   :  { %429 = vsyncadd [#allocation4], 4294967168 }
 0x1ff   :  { %262 = vsyncpa [#allocation3], 1 }
 0x200   :  { %263 = vsyncpa [#allocation6], 1 }
 0x201   :  { %264 = vsyncpa [#allocation4], 1 }

</bundles_post_ra>
